<compile_context>
chip_gen: v7x
topology: tpu7x:2x2x1
jax: 0.10.0
libtpu: 0.0.40
codegen_flags: <defaults>
</compile_context>

<pallas_src>
import functools
import math

import jax
import jax.numpy as jnp
from jax.experimental import pallas as pl
from jax.experimental.pallas import tpu as pltpu


def _round_up(x: int, m: int) -> int:
    return ((x + m - 1) // m) * m


def _angle_sum_kernel(x_ref, tgt_ref, out_ref, *, n_valid, block_elems):
    """One tile: sum of acos(clamp(<v_hat, t_hat>)) over valid samples.

    x_ref  : (2, TM, 128) prediction components (row 0 = x, row 1 = y), any float dtype
    tgt_ref: (TM, 128)    raw target angle index (int or float)
    out_ref: (1, 1, 1)    per-tile partial sum, f32
    """
    x0 = x_ref[0].astype(jnp.float32)          # (TM, 128)
    x1 = x_ref[1].astype(jnp.float32)

    # theta = target * pi/181 in [0, pi).  Shift to u = theta - pi/2 in
    # [-pi/2, pi/2]; then cos(theta) = -sin(u), sin(theta) = cos(u).
    # Polynomials are mul/add only (VPU); assumes target is an angle index
    # in [0, 181) as in the reference module.
    u = (tgt_ref[...].astype(jnp.float32) * jnp.float32(math.pi / 181.0)
         - jnp.float32(math.pi / 2.0))
    z = u * u
    # sin(u), |u| <= pi/2, truncation error ~6e-8
    ps = jnp.float32(-2.5052108385e-08)
    ps = ps * z + jnp.float32(2.7557319224e-06)
    ps = ps * z + jnp.float32(-1.9841269841e-04)
    ps = ps * z + jnp.float32(8.3333333333e-03)
    ps = ps * z + jnp.float32(-1.6666666667e-01)
    sin_u = (ps * z + jnp.float32(1.0)) * u
    # cos(u), |u| <= pi/2, truncation error ~7e-9
    pc = jnp.float32(2.0876756988e-09)
    pc = pc * z + jnp.float32(-2.7557319224e-07)
    pc = pc * z + jnp.float32(2.4801587302e-05)
    pc = pc * z + jnp.float32(-1.3888888889e-03)
    pc = pc * z + jnp.float32(4.1666666667e-02)
    pc = pc * z + jnp.float32(-5.0000000000e-01)
    cos_u = pc * z + jnp.float32(1.0)
    ct = -sin_u            # cos(theta)
    st = cos_u             # sin(theta)

    # Normalize prediction (EUP rsqrt) and dot with the target unit vector.
    inv_norm = jax.lax.rsqrt(x0 * x0 + x1 * x1)
    d = (x0 * ct + x1 * st) * inv_norm

    # acos(clamp(d, -1+1e-6, 1-1e-6)) via reflection: work on a = min(|d|, 1-1e-6),
    # acos(a) ~= sqrt(1-a) * P7(a)  (|err| ~ 1e-7), then acos(-a) = pi - acos(a).
    a = jnp.minimum(jnp.abs(d), jnp.float32(1.0 - 1e-6))
    p = jnp.float32(-0.0012624911)
    p = p * a + jnp.float32(0.0066700901)
    p = p * a + jnp.float32(-0.0170881256)
    p = p * a + jnp.float32(0.0308918810)
    p = p * a + jnp.float32(-0.0501743046)
    p = p * a + jnp.float32(0.0889789874)
    p = p * a + jnp.float32(-0.2145988016)
    p = p * a + jnp.float32(1.5707963050)
    r = jnp.sqrt(jnp.float32(1.0) - a) * p
    acos = jnp.where(d >= 0.0, r, jnp.float32(math.pi) - r)

    if n_valid is None:
        out_ref[...] = jnp.sum(acos).reshape(1, 1, 1)
    else:
        i = pl.program_id(0)
        last = pl.num_programs(0) - 1

        @pl.when(i != last)
        def _():
            out_ref[...] = jnp.sum(acos).reshape(1, 1, 1)

        @pl.when(i == last)
        def _():
            # Only the last tile can contain padding / out-of-range rows.
            # NOTE: the mask MUST stay AFTER acos — the padded tail holds
            # garbage/NaN (e.g. rsqrt(0)=inf) that this select discards.
            tm, lanes = acos.shape
            idx = (i * block_elems
                   + jax.lax.broadcasted_iota(jnp.int32, (tm, lanes), 0) * lanes
                   + jax.lax.broadcasted_iota(jnp.int32, (tm, lanes), 1))
            masked = jnp.where(idx < n_valid, acos, 0.0)
            out_ref[...] = jnp.sum(masked).reshape(1, 1, 1)


def angle_loss(pred, target, *, block_rows: int = 1024):
    """Mirrors AngleLoss.forward for pred (N, 2), target (N,) -> scalar f32."""
    assert pred.ndim == 2 and pred.shape[1] == 2, "expected (N, 2) predictions"
    assert target.shape == (pred.shape[0],), "expected (N,) target angles"
    n = pred.shape[0]

    n_pad = _round_up(n, 128)
    nr = n_pad // 128

    # Lay N out as (rows, 128 lanes) for fully dense vregs.
    # TODO(synk): pred.T is one extra HBM pass over pred; remove by taking a
    # (2, N) layout from the caller or deinterleaving (N, 2) in-kernel.
    x = pred.T                                      # (2, N), native dtype
    tgt = target                                    # (N,), native dtype (4 B/sample)
    if n_pad != n:
        x = jnp.pad(x, ((0, 0), (0, n_pad - n)))
        tgt = jnp.pad(tgt, ((0, n_pad - n),))
    x = x.reshape(2, nr, 128)
    tgt = tgt.reshape(nr, 128)

    # Tile rows: big tiles to amortize the ~0.35 us per-step overhead, but at
    # least 2 tiles when possible so v7x megacore can split the parallel axis.
    # (block_rows=1024 f32 -> ~3 MiB double-buffered: inside every chip's
    # scoped-VMEM default, so no vmem_limit_bytes override is needed.)
    if nr <= 8:
        tm = nr                                     # single full-extent tile
    else:
        tm = min(block_rows, _round_up(-(-nr // 2), 8))
    n_tiles = -(-nr // tm)                          # cdiv
    block_elems = tm * 128

    # Skip in-kernel masking entirely when the grid covers exactly N samples.
    n_valid = None if n_tiles * block_elems == n else n
    kernel = functools.partial(
        _angle_sum_kernel, n_valid=n_valid, block_elems=block_elems)

    partials = pl.pallas_call(
        kernel,
        out_shape=jax.ShapeDtypeStruct((n_tiles, 1, 1), jnp.float32),
        grid_spec=pltpu.PrefetchScalarGridSpec(
            num_scalar_prefetch=0,
            grid=(n_tiles,),
            in_specs=[
                pl.BlockSpec((2, tm, 128), lambda i: (0, i, 0)),
                pl.BlockSpec((tm, 128), lambda i: (i, 0)),
            ],
            out_specs=pl.BlockSpec((1, 1, 1), lambda i: (i, 0, 0)),
        ),
        compiler_params=pltpu.CompilerParams(
            dimension_semantics=("parallel",),
        ),
    )(x, tgt)

    # mean over dim 0 (matches .mean(dim=0) in the reference)
    return jnp.sum(partials) / jnp.float32(n)


def _reference(pred, target):
    """Pure-JAX reimplementation of the PyTorch AngleLoss.forward."""
    theta = target.astype(jnp.float32) * (math.pi / 181.0)
    tvec = jnp.stack([jnp.cos(theta), jnp.sin(theta)], axis=1)    # (N, 2)
    v = pred.astype(jnp.float32)
    v = v / jnp.linalg.norm(v, axis=1, keepdims=True)
    dot = jnp.sum(v * tvec, axis=1)
    return jnp.mean(jnp.arccos(jnp.clip(dot, -1.0 + 1e-6, 1.0 - 1e-6)), axis=0)


if __name__ == "__main__":
    key = jax.random.PRNGKey(0)
    k1, k2, k3, k4 = jax.random.split(key, 4)

    # Case 1: N not a multiple of 128 -> exercises the masked last tile.
    n1 = 500
    pred1 = jax.random.normal(k1, (n1, 2), dtype=jnp.float32)
    tgt1 = jax.random.randint(k2, (n1,), 0, 181, dtype=jnp.int32)
    loss1 = jax.block_until_ready(angle_loss(pred1, tgt1))
    ref1 = _reference(pred1, tgt1)
    assert jnp.allclose(loss1, ref1, rtol=1e-5, atol=2e-5), (loss1, ref1)

    # Case 2: forced multi-tile grid -> exercises per-tile partial sums, the
    # parallel grid axis (megacore split on v7x) and the unmasked fast path.
    n2 = 2000
    pred2 = jax.random.normal(k3, (n2, 2), dtype=jnp.float32)
    tgt2 = jax.random.randint(k4, (n2,), 0, 181, dtype=jnp.int32)
    loss2 = jax.block_until_ready(angle_loss(pred2, tgt2, block_rows=8))
    ref2 = _reference(pred2, tgt2)
    assert jnp.allclose(loss2, ref2, rtol=1e-5, atol=2e-5), (loss2, ref2)

    print("KERNEL_OK")
</pallas_src>

<mosaic_0001>
module attributes {stable_mosaic.version = 11 : i64} {
  func.func @_angle_sum_kernel(%arg0: i32, %arg1: memref<2x4x128xf32, #tpu.memory_space<vmem>>, %arg2: memref<4x128xi32, #tpu.memory_space<vmem>>, %arg3: memref<1x1x1xf32, #tpu.memory_space<vmem>>) attributes {dimension_semantics = [#tpu.dimension_semantics<parallel>], iteration_bounds = array<i64: 1>, scalar_prefetch = 0 : i64, scratch_operands = 0 : i64, tpu.core_type = #tpu.core_type<tc>, window_params = [{transform_indices = @transform_0, window_bounds = array<i64: 2, 4, 128>}, {transform_indices = @transform_1, window_bounds = array<i64: 4, 128>}, {transform_indices = @transform_2, window_bounds = array<i64: 1, 1, 1>}]} {
    %c0 = arith.constant 0 : index
    %c0_0 = arith.constant 0 : index
    %c0_1 = arith.constant 0 : index
    %0 = vector.load %arg1[%c0, %c0_0, %c0_1] : memref<2x4x128xf32, #tpu.memory_space<vmem>>, vector<1x4x128xf32>
    %1 = vector.shape_cast %0 : vector<1x4x128xf32> to vector<4x128xf32>
    %c1 = arith.constant 1 : index
    %c0_2 = arith.constant 0 : index
    %c0_3 = arith.constant 0 : index
    %2 = vector.load %arg1[%c1, %c0_2, %c0_3] : memref<2x4x128xf32, #tpu.memory_space<vmem>>, vector<1x4x128xf32>
    %3 = vector.shape_cast %2 : vector<1x4x128xf32> to vector<4x128xf32>
    %c0_4 = arith.constant 0 : index
    %c0_5 = arith.constant 0 : index
    %4 = vector.load %arg2[%c0_4, %c0_5] : memref<4x128xi32, #tpu.memory_space<vmem>>, vector<4x128xi32>
    %5 = arith.sitofp %4 : vector<4x128xi32> to vector<4x128xf32>
    %cst = arith.constant 0.0173568651 : f32
    %6 = vector.broadcast %cst : f32 to vector<4x128xf32>
    %7 = arith.mulf %5, %6 : vector<4x128xf32>
    %cst_6 = arith.constant 1.57079637 : f32
    %8 = vector.broadcast %cst_6 : f32 to vector<4x128xf32>
    %9 = arith.subf %7, %8 : vector<4x128xf32>
    %10 = arith.mulf %9, %9 : vector<4x128xf32>
    %cst_7 = arith.constant -2.50521079E-8 : f32
    %11 = vector.broadcast %cst_7 : f32 to vector<4x128xf32>
    %12 = arith.mulf %11, %10 : vector<4x128xf32>
    %cst_8 = arith.constant 2.75573188E-6 : f32
    %13 = vector.broadcast %cst_8 : f32 to vector<4x128xf32>
    %14 = arith.addf %12, %13 : vector<4x128xf32>
    %15 = arith.mulf %14, %10 : vector<4x128xf32>
    %cst_9 = arith.constant -1.98412701E-4 : f32
    %16 = vector.broadcast %cst_9 : f32 to vector<4x128xf32>
    %17 = arith.addf %15, %16 : vector<4x128xf32>
    %18 = arith.mulf %17, %10 : vector<4x128xf32>
    %cst_10 = arith.constant 0.00833333377 : f32
    %19 = vector.broadcast %cst_10 : f32 to vector<4x128xf32>
    %20 = arith.addf %18, %19 : vector<4x128xf32>
    %21 = arith.mulf %20, %10 : vector<4x128xf32>
    %cst_11 = arith.constant -0.166666672 : f32
    %22 = vector.broadcast %cst_11 : f32 to vector<4x128xf32>
    %23 = arith.addf %21, %22 : vector<4x128xf32>
    %24 = arith.mulf %23, %10 : vector<4x128xf32>
    %cst_12 = arith.constant 1.000000e+00 : f32
    %25 = vector.broadcast %cst_12 : f32 to vector<4x128xf32>
    %26 = arith.addf %24, %25 : vector<4x128xf32>
    %27 = arith.mulf %26, %9 : vector<4x128xf32>
    %cst_13 = arith.constant 2.08767559E-9 : f32
    %28 = vector.broadcast %cst_13 : f32 to vector<4x128xf32>
    %29 = arith.mulf %28, %10 : vector<4x128xf32>
    %cst_14 = arith.constant -2.755732E-7 : f32
    %30 = vector.broadcast %cst_14 : f32 to vector<4x128xf32>
    %31 = arith.addf %29, %30 : vector<4x128xf32>
    %32 = arith.mulf %31, %10 : vector<4x128xf32>
    %cst_15 = arith.constant 2.48015876E-5 : f32
    %33 = vector.broadcast %cst_15 : f32 to vector<4x128xf32>
    %34 = arith.addf %32, %33 : vector<4x128xf32>
    %35 = arith.mulf %34, %10 : vector<4x128xf32>
    %cst_16 = arith.constant -0.00138888892 : f32
    %36 = vector.broadcast %cst_16 : f32 to vector<4x128xf32>
    %37 = arith.addf %35, %36 : vector<4x128xf32>
    %38 = arith.mulf %37, %10 : vector<4x128xf32>
    %cst_17 = arith.constant 0.0416666679 : f32
    %39 = vector.broadcast %cst_17 : f32 to vector<4x128xf32>
    %40 = arith.addf %38, %39 : vector<4x128xf32>
    %41 = arith.mulf %40, %10 : vector<4x128xf32>
    %cst_18 = arith.constant -5.000000e-01 : f32
    %42 = vector.broadcast %cst_18 : f32 to vector<4x128xf32>
    %43 = arith.addf %41, %42 : vector<4x128xf32>
    %44 = arith.mulf %43, %10 : vector<4x128xf32>
    %cst_19 = arith.constant 1.000000e+00 : f32
    %45 = vector.broadcast %cst_19 : f32 to vector<4x128xf32>
    %46 = arith.addf %44, %45 : vector<4x128xf32>
    %cst_20 = arith.constant 0.000000e+00 : f32
    %47 = vector.broadcast %cst_20 : f32 to vector<4x128xf32>
    %48 = arith.subf %47, %27 : vector<4x128xf32>
    %49 = arith.mulf %1, %1 : vector<4x128xf32>
    %50 = arith.mulf %3, %3 : vector<4x128xf32>
    %51 = arith.addf %49, %50 : vector<4x128xf32>
    %52 = math.rsqrt %51 : vector<4x128xf32>
    %53 = arith.mulf %1, %48 : vector<4x128xf32>
    %54 = arith.mulf %3, %46 : vector<4x128xf32>
    %55 = arith.addf %53, %54 : vector<4x128xf32>
    %56 = arith.mulf %55, %52 : vector<4x128xf32>
    %57 = math.absf %56 : vector<4x128xf32>
    %cst_21 = arith.constant 0.999998986 : f32
    %58 = vector.broadcast %cst_21 : f32 to vector<4x128xf32>
    %59 = arith.minimumf %57, %58 : vector<4x128xf32>
    %cst_22 = arith.constant -0.0012624911 : f32
    %60 = vector.broadcast %cst_22 : f32 to vector<4x128xf32>
    %61 = arith.mulf %60, %59 : vector<4x128xf32>
    %cst_23 = arith.constant 6.670090e-03 : f32
    %62 = vector.broadcast %cst_23 : f32 to vector<4x128xf32>
    %63 = arith.addf %61, %62 : vector<4x128xf32>
    %64 = arith.mulf %63, %59 : vector<4x128xf32>
    %cst_24 = arith.constant -0.0170881264 : f32
    %65 = vector.broadcast %cst_24 : f32 to vector<4x128xf32>
    %66 = arith.addf %64, %65 : vector<4x128xf32>
    %67 = arith.mulf %66, %59 : vector<4x128xf32>
    %cst_25 = arith.constant 0.0308918804 : f32
    %68 = vector.broadcast %cst_25 : f32 to vector<4x128xf32>
    %69 = arith.addf %67, %68 : vector<4x128xf32>
    %70 = arith.mulf %69, %59 : vector<4x128xf32>
    %cst_26 = arith.constant -0.0501743034 : f32
    %71 = vector.broadcast %cst_26 : f32 to vector<4x128xf32>
    %72 = arith.addf %70, %71 : vector<4x128xf32>
    %73 = arith.mulf %72, %59 : vector<4x128xf32>
    %cst_27 = arith.constant 0.0889789909 : f32
    %74 = vector.broadcast %cst_27 : f32 to vector<4x128xf32>
    %75 = arith.addf %73, %74 : vector<4x128xf32>
    %76 = arith.mulf %75, %59 : vector<4x128xf32>
    %cst_28 = arith.constant -0.214598805 : f32
    %77 = vector.broadcast %cst_28 : f32 to vector<4x128xf32>
    %78 = arith.addf %76, %77 : vector<4x128xf32>
    %79 = arith.mulf %78, %59 : vector<4x128xf32>
    %cst_29 = arith.constant 1.57079625 : f32
    %80 = vector.broadcast %cst_29 : f32 to vector<4x128xf32>
    %81 = arith.addf %79, %80 : vector<4x128xf32>
    %cst_30 = arith.constant 1.000000e+00 : f32
    %82 = vector.broadcast %cst_30 : f32 to vector<4x128xf32>
    %83 = arith.subf %82, %59 : vector<4x128xf32>
    %84 = math.sqrt %83 : vector<4x128xf32>
    %85 = arith.mulf %84, %81 : vector<4x128xf32>
    %cst_31 = arith.constant 0.000000e+00 : f32
    %86 = vector.broadcast %cst_31 : f32 to vector<4x128xf32>
    %87 = arith.cmpf oge, %56, %86 : vector<4x128xf32>
    %cst_32 = arith.constant 3.14159274 : f32
    %88 = vector.broadcast %cst_32 : f32 to vector<4x128xf32>
    %89 = arith.subf %88, %85 : vector<4x128xf32>
    %90 = arith.select %87, %85, %89 : vector<4x128xi1>, vector<4x128xf32>
    %c0_i32 = arith.constant 0 : i32
    %91 = arith.cmpi ne, %arg0, %c0_i32 : i32
    %92 = arith.extui %91 : i1 to i32
    %c0_i32_33 = arith.constant 0 : i32
    %93 = arith.cmpi ne, %92, %c0_i32_33 : i32
    scf.if %93 {
      %97 = vector.shape_cast %90 : vector<4x128xf32> to vector<1x4x128xf32>
      %cst_36 = arith.constant dense<0.000000e+00> : vector<1xf32>
      %98 = vector.multi_reduction <add>, %97, %cst_36 [1, 2] : vector<1x4x128xf32> to vector<1xf32>
      %99 = vector.shape_cast %98 : vector<1xf32> to vector<1x1x1xf32>
      %100 = vector.extract %99[0, 0, 0] : f32 from vector<1x1x1xf32>
      %101 = vector.broadcast %100 : f32 to vector<1x1x1xf32>
      %c0_37 = arith.constant 0 : index
      %c0_38 = arith.constant 0 : index
      %c0_39 = arith.constant 0 : index
      %102 = vector.load %arg3[%c0_37, %c0_38, %c0_39] : memref<1x1x1xf32, #tpu.memory_space<vmem>>, vector<1x1x1xf32>
      tpu.vector_store %arg3[%c0_37, %c0_38, %c0_39], %101 {strides = array<i32>} : memref<1x1x1xf32, #tpu.memory_space<vmem>>, vector<1x1x1xf32>,
    } else {
    }
    %c0_i32_34 = arith.constant 0 : i32
    %94 = arith.cmpi eq, %arg0, %c0_i32_34 : i32
    %95 = arith.extui %94 : i1 to i32
    %c0_i32_35 = arith.constant 0 : i32
    %96 = arith.cmpi ne, %95, %c0_i32_35 : i32
    scf.if %96 {
      %c512_i32 = arith.constant 512 : i32
      %97 = arith.muli %arg0, %c512_i32 : i32
      %98 = tpu.iota {dimensions = array<i32: 0>} : vector<4x128xi32>
      %c128_i32 = arith.constant 128 : i32
      %99 = vector.broadcast %c128_i32 : i32 to vector<4x128xi32>
      %100 = arith.muli %98, %99 : vector<4x128xi32>
      %101 = vector.broadcast %97 : i32 to vector<4x128xi32>
      %102 = arith.addi %101, %100 : vector<4x128xi32>
      %103 = tpu.iota {dimensions = array<i32: 1>} : vector<4x128xi32>
      %104 = arith.addi %102, %103 : vector<4x128xi32>
      %c500_i32 = arith.constant 500 : i32
      %105 = vector.broadcast %c500_i32 : i32 to vector<4x128xi32>
      %106 = arith.cmpi slt, %104, %105 : vector<4x128xi32>
      %cst_36 = arith.constant 0.000000e+00 : f32
      %107 = vector.broadcast %cst_36 : f32 to vector<4x128xf32>
      %108 = arith.select %106, %90, %107 : vector<4x128xi1>, vector<4x128xf32>
      %109 = vector.shape_cast %108 : vector<4x128xf32> to vector<1x4x128xf32>
      %cst_37 = arith.constant dense<0.000000e+00> : vector<1xf32>
      %110 = vector.multi_reduction <add>, %109, %cst_37 [1, 2] : vector<1x4x128xf32> to vector<1xf32>
      %111 = vector.shape_cast %110 : vector<1xf32> to vector<1x1x1xf32>
      %112 = vector.extract %111[0, 0, 0] : f32 from vector<1x1x1xf32>
      %113 = vector.broadcast %112 : f32 to vector<1x1x1xf32>
      %c0_38 = arith.constant 0 : index
      %c0_39 = arith.constant 0 : index
      %c0_40 = arith.constant 0 : index
      %114 = vector.load %arg3[%c0_38, %c0_39, %c0_40] : memref<1x1x1xf32, #tpu.memory_space<vmem>>, vector<1x1x1xf32>
      tpu.vector_store %arg3[%c0_38, %c0_39, %c0_40], %113 {strides = array<i32>} : memref<1x1x1xf32, #tpu.memory_space<vmem>>, vector<1x1x1xf32>,
    } else {
    }
    return
  }
  func.func @transform_0(%arg0: i32) -> (i32, i32, i32) {
    %c0_i32 = arith.constant 0 : i32
    %c0_i32_0 = arith.constant 0 : i32
    %c0_i32_1 = arith.constant 0 : i32
    return %c0_i32, %arg0, %c0_i32_0 : i32, i32, i32
  }
  func.func @transform_1(%arg0: i32) -> (i32, i32) {
    %c0_i32 = arith.constant 0 : i32
    %c0_i32_0 = arith.constant 0 : i32
    return %arg0, %c0_i32 : i32, i32
  }
  func.func @transform_2(%arg0: i32) -> (i32, i32, i32) {
    %c0_i32 = arith.constant 0 : i32
    %c0_i32_0 = arith.constant 0 : i32
    %c0_i32_1 = arith.constant 0 : i32
    return %arg0, %c0_i32, %c0_i32_0 : i32, i32, i32
  }
}

</mosaic_0001>

<bundles_post_ra>
// kernel: tpu_custom_call.1
= control target key start
LH: loop header
LB: loop body
LE: loop exit
PB: predicated region body
PF: predicated region fallthrough
CT: control target
= control target key end

     0   :  { %7 = vsyncpa [#allocation3], 0  ;;  %s309_s0 = inlined_call_operand.hbm [shape: f32[2,4,128], index: 0, kind: input, shape index: {}]   ;;  %s310_s1 = inlined_call_operand.hbm [shape: s32[4,128], index: 1, kind: input, shape index: {}]   ;;  %s311_s2 = inlined_call_operand.hbm [shape: f32[1,1,1], index: 2, kind: output, shape index: {}]  }
   0x1   :  { %8 = vsyncpa [#allocation6], 0 }
   0x2   :  { %9 = vsyncpa [#allocation4], 0  ;;  %s253_s9 = smov [#allocation2]   ;;  %s181_s13 = scalar_lea.hbm %s309_s0, 128 }
   0x3   :  { %s15_s10 = sshll.u32 %s253_s9, 4  ;;  %p182_p0 = scmp.ne.s32.totalorder %s309_s0, %s181_s13  ;;  %s16_s10 = int_to_ptr.vmem [resolvable:$true] %s15_s10 }
   0x4   :  { %p185_p1 = scmp.lt.u32.totalorder %s181_s13, %s309_s0 }
   0x6   :  { %p187_p2 = pnand %p185_p1, %p182_p0 }
   0x8   :  { %190 = shalt.err (!%p187_p2)
}
   0x9   :  { %s191_s18 = scalar_lea.vmem %s16_s10, 128  ;;  %p196_p4 = scmp.lt.s32.totalorder %s16_s10, %s16_s10 }
   0xa   :  { %p192_p3 = scmp.ne.s32.totalorder %s16_s10, %s191_s18  ;;  %p197_p5 = scmp.lt.s32.totalorder %s191_s18, %s191_s18 }
   0xc   :  { %p198_p6 = por %p197_p5, %p196_p4 }
   0xe   :  { %p199_p7 = pnand %p198_p6, %p192_p3 }
  0x10   :  { %202 = shalt.err (!%p199_p7)
}
  0x11   :  { %s254_s19 = smov 64   ;;  %s255_s20 = smov 4  }
  0x12   :  { %21 = dma.hbm_to_vmem [thread:$0]  %s309_s0, 128, %s16_s10, [#allocation3], %s254_s19, %s254_s19, %s255_s20  }
  0x13   :  { %s256_s23 = smov [#allocation5]   ;;  %s203_s27 = scalar_lea.hbm %s310_s1, 64 }
  0x14   :  { %s28_s24 = sshll.u32 %s256_s23, 4  ;;  %p204_p8 = scmp.ne.s32.totalorder %s310_s1, %s203_s27  ;;  %s29_s24 = int_to_ptr.vmem [resolvable:$true] %s28_s24 }
  0x15   :  { %p207_p9 = scmp.lt.u32.totalorder %s203_s27, %s310_s1 }
  0x17   :  { %p209_p10 = pnand %p207_p9, %p204_p8 }
  0x19   :  { %212 = shalt.err (!%p209_p10)
}
  0x1a   :  { %s213_s4 = scalar_lea.vmem %s29_s24, 64  ;;  %p218_p12 = scmp.lt.s32.totalorder %s29_s24, %s29_s24 }
  0x1b   :  { %p214_p11 = scmp.ne.s32.totalorder %s29_s24, %s213_s4  ;;  %p219_p13 = scmp.lt.s32.totalorder %s213_s4, %s213_s4 }
  0x1d   :  { %p220_p0 = por %p219_p13, %p218_p12 }
  0x1f   :  { %p221_p1 = pnand %p220_p0, %p214_p11 }
  0x21   :  { %224 = shalt.err (!%p221_p1)
}
  0x22   :  { %31 = dma.hbm_to_vmem [thread:$0]  %s310_s1, 64, %s29_s24, [#allocation6]  }
  0x23   :  { %247 = dma.done.wait [#allocation3], 128  }
  0x24   :  { %248 = vsyncadd [#allocation3], 4294967168 }
  0x25   :  { %249 = dma.done.wait [#allocation6], 64  }
  0x26   :  { %250 = vsyncadd [#allocation6], 4294967232  ;;  %v41_v0 = vld [vmem:[#allocation5] sm:$0xf]  ;;  %v38_v9 = vld [vmem:[#allocation2] sm:$0xf]  ;;  %v129_v50 = vlaneseq }
  0x27   :  { %v42_v1 = vcvt.s32.f32 %v41_v0  ;;  %v40_v10 = vld [vmem:[#allocation2 + $0x4] sm:$0xf]  ;;  %v70_v15 = vmul.f32 %v38_v9, %v38_v9  ;;  %vm139_vm4 = vcmask 1043456   ;;  %s257_s1 = smov [#allocation7]   ;;  %vm151_vm5 = vcmask 0  }
  0x28   :  { %v71_v16 = vmul.f32 %v40_v10, %v40_v10  ;;  %v130_v55 = vshrl.u32 %v129_v50, 7  ;;  %v135_v58 = vand.u32 127, %v129_v50  ;;  %s159_s6 = sshll.u32 %s257_s1, 4  ;;  %s160_s6 = int_to_ptr.vmem [resolvable:$true] %s159_s6 }
  0x29   :  { %v43_v2 = vmul.f32 0.017356865, %v42_v1  ;;  %s225_s8 = scalar_lea.vmem %s160_s6, 16  ;;  %s229_s9 = scalar_lea.vmem %s160_s6, 32 }
  0x2a   :  { %v72_v21 = vadd.f32 %v71_v16, %v70_v15  ;;  %v131_v61 = vmul.u32 128, %v130_v55  ;;  %p226_p2 = scmp.ne.s32.totalorder %s160_s6, %s225_s8  ;;  %p230_p3 = scmp.lt.s32.totalorder %s160_s6, %s160_s6 }
  0x2b   :  { %v169_v3 = vadd.f32 -1.5707964, %v43_v2  ;;  %p231_p4 = scmp.lt.s32.totalorder %s229_s9, %s225_s8 }
  0x2c   :  { %177 = vrsqrt.f32 %v72_v21  ;;  %v136_v1 = vadd.s32 %v135_v58, %v131_v61 }
  0x2d   :  { %v45_v4 = vmul.f32 %v169_v3, %v169_v3  ;;  %p232_p5 = por %p231_p4, %p230_p3 }
  0x2e   :  { %vm137_vm3 = vcmp.lt.s32.totalorder %v136_v1, 500 }
  0x2f   :  { %v46_v5 = vmul.f32 -2.5052108e-08, %v45_v4  ;;  %v57_v6 = vmul.f32 2.0876756e-09, %v45_v4  ;;  %p233_p6 = pnand %p232_p5, %p226_p2 }
  0x31   :  { %v47_v7 = vadd.f32 2.7557319e-06, %v46_v5  ;;  %v58_v8 = vadd.f32 -2.755732e-07, %v57_v6 }
  0x33   :  { %v48_v11 = vmul.f32 %v47_v7, %v45_v4  ;;  %v59_v12 = vmul.f32 %v58_v8, %v45_v4 }
  0x35   :  { %v49_v13 = vadd.f32 -0.0001984127, %v48_v11  ;;  %v60_v14 = vadd.f32 2.4801588e-05, %v59_v12 }
  0x36   :  { %v178_v36 = vpop.eup %177 }
  0x37   :  { %v50_v17 = vmul.f32 %v49_v13, %v45_v4  ;;  %v61_v18 = vmul.f32 %v60_v14, %v45_v4 }
  0x39   :  { %v51_v19 = vadd.f32 0.008333334, %v50_v17  ;;  %v62_v20 = vadd.f32 -0.0013888889, %v61_v18 }
  0x3b   :  { %v52_v22 = vmul.f32 %v51_v19, %v45_v4  ;;  %v63_v23 = vmul.f32 %v62_v20, %v45_v4 }
  0x3d   :  { %v53_v24 = vadd.f32 -0.16666667, %v52_v22  ;;  %v64_v25 = vadd.f32 0.041666668, %v63_v23 }
  0x3f   :  { %v54_v26 = vmul.f32 %v53_v24, %v45_v4  ;;  %v65_v27 = vmul.f32 %v64_v25, %v45_v4 }
  0x41   :  { %v55_v28 = vadd.f32 1.0, %v54_v26  ;;  %v66_v29 = vadd.f32 -0.5, %v65_v27 }
  0x43   :  { %v56_v30 = vmul.f32 %v169_v3, %v55_v28  ;;  %v67_v31 = vmul.f32 %v66_v29, %v45_v4 }
  0x45   :  { %v68_v32 = vadd.f32 1.0, %v67_v31  ;;  %v69_v33 = vsub.f32 0.0, %v56_v30 }
  0x47   :  { %v74_v34 = vmul.f32 %v69_v33, %v38_v9  ;;  %v75_v35 = vmul.f32 %v68_v32, %v40_v10 }
  0x49   :  { %v76_v37 = vadd.f32 %v75_v35, %v74_v34 }
  0x4b   :  { %v77_v38 = vmul.f32 %v178_v36, %v76_v37 }
  0x4d   :  { %v78_v39 = vand.u32 2147483647, %v77_v38  ;;  %vm103_vm2 = vcmp.ge.f32.partialorder %v77_v38, 0.0 }
  0x4f   :  { %v79_v40 = vmin.f32 %v78_v39, 0.999999 }
  0x51   :  { %v80_v41 = vmul.f32 -0.0012624911, %v79_v40  ;;  %v94_v42 = vsub.f32 1.0, %v79_v40 }
  0x53   :  { %v81_v43 = vadd.f32 0.00667009, %v80_v41  ;;  %179 = vrsqrt.f32 %v94_v42  ;;  %vm97_vm0 = vcmp.eq.f32.partialorder %v94_v42, inf  ;;  %v100_v57 = vand.u32 2147483648, %v94_v42 }
  0x54   :  { %vm99_vm1 = vcmp.eq.f32.partialorder %v94_v42, 0.0 }
  0x55   :  { %v82_v44 = vmul.f32 %v81_v43, %v79_v40 }
  0x57   :  { %v83_v45 = vadd.f32 -0.017088126, %v82_v44 }
  0x59   :  { %v84_v46 = vmul.f32 %v83_v45, %v79_v40 }
  0x5b   :  { %v85_v47 = vadd.f32 0.03089188, %v84_v46 }
  0x5d   :  { %v86_v48 = vmul.f32 %v85_v47, %v79_v40  ;;  %v180_v51 = vpop.eup %179 }
  0x5e   :  { %v96_v54 = vmul.f32 %v180_v51, %v94_v42 }
  0x5f   :  { %v87_v49 = vadd.f32 -0.050174303, %v86_v48 }
  0x60   :  { %v98_v60 = vsel %vm97_vm0, %v94_v42, %v96_v54 }
  0x61   :  { %v88_v52 = vmul.f32 %v87_v49, %v79_v40  ;;  %v101_v63 = vsel %vm99_vm1, %v100_v57, %v98_v60 }
  0x63   :  { %v89_v53 = vadd.f32 0.08897899, %v88_v52 }
  0x65   :  { %v90_v56 = vmul.f32 %v89_v53, %v79_v40 }
  0x67   :  { %v91_v59 = vadd.f32 -0.2145988, %v90_v56 }
  0x69   :  { %v92_v62 = vmul.f32 %v91_v59, %v79_v40 }
  0x6b   :  { %v93_v0 = vadd.f32 1.5707963, %v92_v62 }
  0x6d   :  { %v102_v2 = vmul.f32 %v101_v63, %v93_v0 }
  0x6f   :  { %v104_v3 = vsub.f32 3.1415927, %v102_v2 }
  0x71   :  { %v105_v4 = vsel %vm103_vm2, %v102_v2, %v104_v3 }
  0x72   :  { %v138_v5 = vsel %vm137_vm3, %v105_v4, 0.0 }
  0x73   :  { %v140_v6 = vsel %vm139_vm4, %v138_v5, 0.0 }
  0x74   :  { %141 = vadd.xlane.f32.xlu0 %v140_v6 }
 0x101   :  { %v142_v7 = vpop.xlane.xlu0 %141 }
 0x102   :  { %v143_v8 = vrot.slane %v142_v7, 4 }
 0x104   :  { %v144_v9 = vadd.f32 %v143_v8, %v142_v7 }
 0x106   :  { %v145_v10 = vrot.slane %v144_v9, 2 }
 0x108   :  { %v146_v11 = vadd.f32 %v145_v10, %v144_v9 }
 0x10a   :  { %v147_v12 = vrot.slane %v146_v11, 1 }
 0x10c   :  { %v148_v13 = vadd.f32 %v147_v12, %v146_v11 }
 0x10e   :  { %170 = vpush %v148_v13 }
 0x13f   :  { %s171_s7 = spop %170 }
 0x140   :  { %v150_v14 = vstv %s171_s7 }
 0x141   :  { %152 = vst.msk [vmem:[#allocation7] sm:$0x1] %vm151_vm5, %v150_v14 }
 0x142   :  { %236 = shalt.err (!%p233_p6)
}
 0x143   :  { %s237_s12 = scalar_lea.hbm %s311_s2, 16 }
 0x144   :  { %p238_p7 = scmp.ne.s32.totalorder %s311_s2, %s237_s12  ;;  %p241_p8 = scmp.lt.u32.totalorder %s237_s12, %s311_s2 }
 0x146   :  { %p243_p9 = pnand %p241_p8, %p238_p7 }
 0x148   :  { %246 = shalt.err (!%p243_p9)
}
 0x149   :  { %162 = dma.vmem_to_hbm [thread:$0]  %s160_s6, 16, %s311_s2, [#allocation4]  }
 0x14a   :  { %251 = dma.done.wait [#allocation4], 16  }
 0x14b   :  { %252 = vsyncadd [#allocation4], 4294967280 }
 0x14c   :  { %166 = vsyncpa [#allocation3], 1 }
 0x14d   :  { %167 = vsyncpa [#allocation6], 1 }
 0x14e   :  { %168 = vsyncpa [#allocation4], 1 }

</bundles_post_ra>
